<compile_context>
chip_gen: v6e
topology: v6e:2x2x1
jax: 0.10.0
libtpu: 0.0.40
codegen_flags: <defaults>
</compile_context>

<pallas_src>
import functools

import jax
import jax.numpy as jnp
from jax.experimental import pallas as pl
from jax.experimental.pallas import tpu as pltpu

_LANES = 128
_SUBLANES = 8
_CHUNK = _SUBLANES * _LANES          # elements per (8, 128) f32 slab (4 KiB)
_MAX_CHUNKS_PER_TILE = 128           # 128 slabs = 512 KiB per input block


def _bal_ce_kernel(x_ref, t_ref, out_ref, base_acc, pos_acc, cnt_acc, *, n_valid):
    i = pl.program_id(0)

    @pl.when(i == 0)
    def _init():
        base_acc[...] = jnp.zeros_like(base_acc)
        pos_acc[...] = jnp.zeros_like(pos_acc)
        cnt_acc[...] = jnp.zeros_like(cnt_acc)

    x = x_ref[...]                       # (r, 8, 128) f32
    y = t_ref[...]

    # Numerically-stable softplus(-x) = log1p(exp(-|x|)) + max(-x, 0)
    sp_neg = jnp.log1p(jnp.exp(-jnp.abs(x))) + jnp.maximum(-x, 0.0)

    # BCEWithLogits(pos_weight=pw) = [(1-y)*x + sp_neg] + (pw - 1) * y * sp_neg
    base = (1.0 - y) * x + sp_neg        # pos_weight-independent part
    pos = y * sp_neg                     # coefficient of (pos_weight - 1)

    # Reduce only the leading (slab) axis: pure cross-vreg VPU adds, no XLU.
    base_acc[...] += jnp.sum(base, axis=0)
    pos_acc[...] += jnp.sum(pos, axis=0)
    cnt_acc[...] += jnp.sum(y, axis=0)

    @pl.when(i == pl.num_programs(0) - 1)
    def _finalize():
        s_base = jnp.sum(base_acc[...], keepdims=True)   # (1, 1)
        s_pos = jnp.sum(pos_acc[...], keepdims=True)
        cp = jnp.sum(cnt_acc[...], keepdims=True)        # count_pos
        n = jnp.float32(n_valid)
        beta = (n - cp) / n                              # count_neg / (neg + pos)
        pos_w = beta / (1.0 - beta)
        loss_sum = s_base + (pos_w - 1.0) * s_pos
        cost = loss_sum * (1.0 - beta) / n               # ((loss*(1-beta)).mean())
        out_ref[...] = jnp.where(cp == 0.0, jnp.zeros_like(cost), cost)


def bal_ce_pallas(logits, target):
    assert logits.shape == target.shape
    n = int(logits.size)
    assert n > 0

    chunks = -(-n // _CHUNK)                       # number of (8,128) slabs
    n_tiles = -(-chunks // _MAX_CHUNKS_PER_TILE)   # grid length
    r = -(-chunks // n_tiles)                      # slabs per tile (balanced)
    chunks_p = r * n_tiles
    pad = chunks_p * _CHUNK - n

    x = logits.reshape(-1).astype(jnp.float32)
    y = target.reshape(-1).astype(jnp.float32)
    if pad:
        # Sentinel padding: for x = -100, y = 0 the per-element contribution is
        # (1-0)*(-100) + softplus(100) == 0 exactly, and y-sums get 0, so no
        # in-kernel masking is needed.  (Only taken when n % 1024 != 0.)
        x = jnp.pad(x, (0, pad), constant_values=-100.0)
        y = jnp.pad(y, (0, pad))
    xf = x.reshape(chunks_p, _SUBLANES, _LANES)
    yf = y.reshape(chunks_p, _SUBLANES, _LANES)

    kernel = functools.partial(_bal_ce_kernel, n_valid=n)
    out = pl.pallas_call(
        kernel,
        out_shape=jax.ShapeDtypeStruct((1, 1), jnp.float32),
        grid_spec=pltpu.PrefetchScalarGridSpec(
            num_scalar_prefetch=0,
            grid=(n_tiles,),
            in_specs=[pl.BlockSpec((r, _SUBLANES, _LANES), lambda i: (i, 0, 0)),
                      pl.BlockSpec((r, _SUBLANES, _LANES), lambda i: (i, 0, 0))],
            out_specs=pl.BlockSpec((1, 1), lambda i: (0, 0)),
            scratch_shapes=[pltpu.VMEM((_SUBLANES, _LANES), jnp.float32),  # S_base
                            pltpu.VMEM((_SUBLANES, _LANES), jnp.float32),  # S_pos
                            pltpu.VMEM((_SUBLANES, _LANES), jnp.float32)], # count
        ),
        compiler_params=pltpu.CompilerParams(
            dimension_semantics=("arbitrary",)),
    )(xf, yf)
    return out.reshape(1)     # torch module returns shape [1]


def _bal_ce_ref(logits, target):
    """Pure-JAX reference reproducing the PyTorch forward."""
    x = logits.astype(jnp.float32)
    y = target.astype(jnp.float32)
    cp = y.sum()
    cn = (1.0 - y).sum()
    beta = cn / (cn + cp)
    pos_w = beta / (1.0 - beta)
    sp_neg = jnp.log1p(jnp.exp(-jnp.abs(x))) + jnp.maximum(-x, 0.0)
    loss = (1.0 - y) * x + (1.0 + (pos_w - 1.0) * y) * sp_neg
    cost = (loss * (1.0 - beta)).mean()
    return jnp.where(cp == 0.0, 0.0, cost).reshape(1)


if __name__ == "__main__":
    key = jax.random.PRNGKey(0)
    k1, k2, k3, k4 = jax.random.split(key, 4)

    # Main case (divisible by 1024 -> no pad copy, reshape-only wrapper path).
    B, C, H, W = 2, 4, 16, 16
    logits = jax.random.normal(k1, (B, C, H, W), dtype=jnp.float32)
    target = (jax.random.uniform(k2, (B, C, H, W)) > 0.7).astype(jnp.float32)
    out = bal_ce_pallas(logits, target)
    jax.block_until_ready(out)
    ref = _bal_ce_ref(logits, target)
    assert out.shape == (1,)
    assert jnp.allclose(out, ref, atol=1e-5, rtol=1e-5), (out, ref)

    # Ragged case exercising the sentinel-padded tail.
    l2 = jax.random.normal(k3, (2, 3, 15, 17), dtype=jnp.float32)
    t2 = (jax.random.uniform(k4, (2, 3, 15, 17)) > 0.6).astype(jnp.float32)
    out2 = bal_ce_pallas(l2, t2)
    jax.block_until_ready(out2)
    assert jnp.allclose(out2, _bal_ce_ref(l2, t2), atol=1e-5, rtol=1e-5), (
        out2, _bal_ce_ref(l2, t2))

    # count_pos == 0 path must return exactly 0.
    out3 = bal_ce_pallas(logits, jnp.zeros_like(target))
    jax.block_until_ready(out3)
    assert jnp.allclose(out3, jnp.zeros((1,), jnp.float32)), out3

    print("KERNEL_OK")
</pallas_src>

<mosaic_0001>
module attributes {stable_mosaic.version = 11 : i64} {
  func.func @_bal_ce_kernel(%arg0: i32, %arg1: memref<2x8x128xf32, #tpu.memory_space<vmem>>, %arg2: memref<2x8x128xf32, #tpu.memory_space<vmem>>, %arg3: memref<1x1xf32, #tpu.memory_space<vmem>>, %arg4: memref<8x128xf32, #tpu.memory_space<vmem>>, %arg5: memref<8x128xf32, #tpu.memory_space<vmem>>, %arg6: memref<8x128xf32, #tpu.memory_space<vmem>>) attributes {dimension_semantics = [#tpu.dimension_semantics<arbitrary>], iteration_bounds = array<i64: 1>, scalar_prefetch = 0 : i64, scratch_operands = 3 : i64, tpu.core_type = #tpu.core_type<tc>, window_params = [{transform_indices = @transform_0, window_bounds = array<i64: 2, 8, 128>}, {transform_indices = @transform_1, window_bounds = array<i64: 2, 8, 128>}, {pipeline_mode = #tpu.pipeline_mode<synchronous>, transform_indices = @transform_2, window_bounds = array<i64: 1, 1>}]} {
    %c0_i32 = arith.constant 0 : i32
    %0 = arith.cmpi eq, %arg0, %c0_i32 : i32
    %1 = arith.extui %0 : i1 to i32
    %c0_i32_0 = arith.constant 0 : i32
    %2 = arith.cmpi ne, %1, %c0_i32_0 : i32
    scf.if %2 {
      %cst_26 = arith.constant 0.000000e+00 : f32
      %35 = vector.broadcast %cst_26 : f32 to vector<8x128xf32>
      %c0_27 = arith.constant 0 : index
      %c0_28 = arith.constant 0 : index
      %36 = vector.load %arg4[%c0_27, %c0_28] : memref<8x128xf32, #tpu.memory_space<vmem>>, vector<8x128xf32>
      tpu.vector_store %arg4[%c0_27, %c0_28], %35 {strides = array<i32>} : memref<8x128xf32, #tpu.memory_space<vmem>>, vector<8x128xf32>,
      %cst_29 = arith.constant 0.000000e+00 : f32
      %37 = vector.broadcast %cst_29 : f32 to vector<8x128xf32>
      %c0_30 = arith.constant 0 : index
      %c0_31 = arith.constant 0 : index
      %38 = vector.load %arg5[%c0_30, %c0_31] : memref<8x128xf32, #tpu.memory_space<vmem>>, vector<8x128xf32>
      tpu.vector_store %arg5[%c0_30, %c0_31], %37 {strides = array<i32>} : memref<8x128xf32, #tpu.memory_space<vmem>>, vector<8x128xf32>,
      %cst_32 = arith.constant 0.000000e+00 : f32
      %39 = vector.broadcast %cst_32 : f32 to vector<8x128xf32>
      %c0_33 = arith.constant 0 : index
      %c0_34 = arith.constant 0 : index
      %40 = vector.load %arg6[%c0_33, %c0_34] : memref<8x128xf32, #tpu.memory_space<vmem>>, vector<8x128xf32>
      tpu.vector_store %arg6[%c0_33, %c0_34], %39 {strides = array<i32>} : memref<8x128xf32, #tpu.memory_space<vmem>>, vector<8x128xf32>,
    } else {
    }
    %c0 = arith.constant 0 : index
    %c0_1 = arith.constant 0 : index
    %c0_2 = arith.constant 0 : index
    %3 = vector.load %arg1[%c0, %c0_1, %c0_2] : memref<2x8x128xf32, #tpu.memory_space<vmem>>, vector<2x8x128xf32>
    %c0_3 = arith.constant 0 : index
    %c0_4 = arith.constant 0 : index
    %c0_5 = arith.constant 0 : index
    %4 = vector.load %arg2[%c0_3, %c0_4, %c0_5] : memref<2x8x128xf32, #tpu.memory_space<vmem>>, vector<2x8x128xf32>
    %5 = math.absf %3 : vector<2x8x128xf32>
    %cst = arith.constant 0.000000e+00 : f32
    %6 = vector.broadcast %cst : f32 to vector<2x8x128xf32>
    %7 = arith.subf %6, %5 : vector<2x8x128xf32>
    %8 = math.exp %7 : vector<2x8x128xf32>
    %9 = math.log1p %8 : vector<2x8x128xf32>
    %cst_6 = arith.constant 0.000000e+00 : f32
    %10 = vector.broadcast %cst_6 : f32 to vector<2x8x128xf32>
    %11 = arith.subf %10, %3 : vector<2x8x128xf32>
    %cst_7 = arith.constant 0.000000e+00 : f32
    %12 = vector.broadcast %cst_7 : f32 to vector<2x8x128xf32>
    %13 = arith.maximumf %11, %12 : vector<2x8x128xf32>
    %14 = arith.addf %9, %13 : vector<2x8x128xf32>
    %cst_8 = arith.constant 1.000000e+00 : f32
    %15 = vector.broadcast %cst_8 : f32 to vector<2x8x128xf32>
    %16 = arith.subf %15, %4 : vector<2x8x128xf32>
    %17 = arith.mulf %16, %3 : vector<2x8x128xf32>
    %18 = arith.addf %17, %14 : vector<2x8x128xf32>
    %19 = arith.mulf %4, %14 : vector<2x8x128xf32>
    %c0_9 = arith.constant 0 : index
    %c0_10 = arith.constant 0 : index
    %20 = vector.load %arg4[%c0_9, %c0_10] : memref<8x128xf32, #tpu.memory_space<vmem>>, vector<8x128xf32>
    %cst_11 = arith.constant dense<0.000000e+00> : vector<8x128xf32>
    %21 = vector.multi_reduction <add>, %18, %cst_11 [0] : vector<2x8x128xf32> to vector<8x128xf32>
    %22 = arith.addf %20, %21 : vector<8x128xf32>
    %c0_12 = arith.constant 0 : index
    %c0_13 = arith.constant 0 : index
    %23 = vector.load %arg4[%c0_12, %c0_13] : memref<8x128xf32, #tpu.memory_space<vmem>>, vector<8x128xf32>
    tpu.vector_store %arg4[%c0_12, %c0_13], %22 {strides = array<i32>} : memref<8x128xf32, #tpu.memory_space<vmem>>, vector<8x128xf32>,
    %c0_14 = arith.constant 0 : index
    %c0_15 = arith.constant 0 : index
    %24 = vector.load %arg5[%c0_14, %c0_15] : memref<8x128xf32, #tpu.memory_space<vmem>>, vector<8x128xf32>
    %cst_16 = arith.constant dense<0.000000e+00> : vector<8x128xf32>
    %25 = vector.multi_reduction <add>, %19, %cst_16 [0] : vector<2x8x128xf32> to vector<8x128xf32>
    %26 = arith.addf %24, %25 : vector<8x128xf32>
    %c0_17 = arith.constant 0 : index
    %c0_18 = arith.constant 0 : index
    %27 = vector.load %arg5[%c0_17, %c0_18] : memref<8x128xf32, #tpu.memory_space<vmem>>, vector<8x128xf32>
    tpu.vector_store %arg5[%c0_17, %c0_18], %26 {strides = array<i32>} : memref<8x128xf32, #tpu.memory_space<vmem>>, vector<8x128xf32>,
    %c0_19 = arith.constant 0 : index
    %c0_20 = arith.constant 0 : index
    %28 = vector.load %arg6[%c0_19, %c0_20] : memref<8x128xf32, #tpu.memory_space<vmem>>, vector<8x128xf32>
    %cst_21 = arith.constant dense<0.000000e+00> : vector<8x128xf32>
    %29 = vector.multi_reduction <add>, %4, %cst_21 [0] : vector<2x8x128xf32> to vector<8x128xf32>
    %30 = arith.addf %28, %29 : vector<8x128xf32>
    %c0_22 = arith.constant 0 : index
    %c0_23 = arith.constant 0 : index
    %31 = vector.load %arg6[%c0_22, %c0_23] : memref<8x128xf32, #tpu.memory_space<vmem>>, vector<8x128xf32>
    tpu.vector_store %arg6[%c0_22, %c0_23], %30 {strides = array<i32>} : memref<8x128xf32, #tpu.memory_space<vmem>>, vector<8x128xf32>,
    %c0_i32_24 = arith.constant 0 : i32
    %32 = arith.cmpi eq, %arg0, %c0_i32_24 : i32
    %33 = arith.extui %32 : i1 to i32
    %c0_i32_25 = arith.constant 0 : i32
    %34 = arith.cmpi ne, %33, %c0_i32_25 : i32
    scf.if %34 {
      %c0_26 = arith.constant 0 : index
      %c0_27 = arith.constant 0 : index
      %35 = vector.load %arg4[%c0_26, %c0_27] : memref<8x128xf32, #tpu.memory_space<vmem>>, vector<8x128xf32>
      %36 = vector.shape_cast %35 : vector<8x128xf32> to vector<1x8x128xf32>
      %cst_28 = arith.constant dense<0.000000e+00> : vector<1xf32>
      %37 = vector.multi_reduction <add>, %36, %cst_28 [1, 2] : vector<1x8x128xf32> to vector<1xf32>
      %38 = vector.shape_cast %37 : vector<1xf32> to vector<1x1x1xf32>
      %39 = vector.extract %38[0, 0, 0] : f32 from vector<1x1x1xf32>
      %40 = vector.broadcast %39 : f32 to vector<1x1xf32>
      %c0_29 = arith.constant 0 : index
      %c0_30 = arith.constant 0 : index
      %41 = vector.load %arg5[%c0_29, %c0_30] : memref<8x128xf32, #tpu.memory_space<vmem>>, vector<8x128xf32>
      %42 = vector.shape_cast %41 : vector<8x128xf32> to vector<1x8x128xf32>
      %cst_31 = arith.constant dense<0.000000e+00> : vector<1xf32>
      %43 = vector.multi_reduction <add>, %42, %cst_31 [1, 2] : vector<1x8x128xf32> to vector<1xf32>
      %44 = vector.shape_cast %43 : vector<1xf32> to vector<1x1x1xf32>
      %45 = vector.extract %44[0, 0, 0] : f32 from vector<1x1x1xf32>
      %46 = vector.broadcast %45 : f32 to vector<1x1xf32>
      %c0_32 = arith.constant 0 : index
      %c0_33 = arith.constant 0 : index
      %47 = vector.load %arg6[%c0_32, %c0_33] : memref<8x128xf32, #tpu.memory_space<vmem>>, vector<8x128xf32>
      %48 = vector.shape_cast %47 : vector<8x128xf32> to vector<1x8x128xf32>
      %cst_34 = arith.constant dense<0.000000e+00> : vector<1xf32>
      %49 = vector.multi_reduction <add>, %48, %cst_34 [1, 2] : vector<1x8x128xf32> to vector<1xf32>
      %50 = vector.shape_cast %49 : vector<1xf32> to vector<1x1x1xf32>
      %51 = vector.extract %50[0, 0, 0] : f32 from vector<1x1x1xf32>
      %52 = vector.broadcast %51 : f32 to vector<1x1xf32>
      %cst_35 = arith.constant 2.048000e+03 : f32
      %53 = vector.broadcast %cst_35 : f32 to vector<1x1xf32>
      %54 = arith.subf %53, %52 : vector<1x1xf32>
      %cst_36 = arith.constant 2.048000e+03 : f32
      %55 = vector.broadcast %cst_36 : f32 to vector<1x1xf32>
      %56 = arith.divf %54, %55 : vector<1x1xf32>
      %cst_37 = arith.constant 1.000000e+00 : f32
      %57 = vector.broadcast %cst_37 : f32 to vector<1x1xf32>
      %58 = arith.subf %57, %56 : vector<1x1xf32>
      %59 = arith.divf %56, %58 : vector<1x1xf32>
      %cst_38 = arith.constant 1.000000e+00 : f32
      %60 = vector.broadcast %cst_38 : f32 to vector<1x1xf32>
      %61 = arith.subf %59, %60 : vector<1x1xf32>
      %62 = arith.mulf %61, %46 : vector<1x1xf32>
      %63 = arith.addf %40, %62 : vector<1x1xf32>
      %cst_39 = arith.constant 1.000000e+00 : f32
      %64 = vector.broadcast %cst_39 : f32 to vector<1x1xf32>
      %65 = arith.subf %64, %56 : vector<1x1xf32>
      %66 = arith.mulf %63, %65 : vector<1x1xf32>
      %cst_40 = arith.constant 2.048000e+03 : f32
      %67 = vector.broadcast %cst_40 : f32 to vector<1x1xf32>
      %68 = arith.divf %66, %67 : vector<1x1xf32>
      %cst_41 = arith.constant 0.000000e+00 : f32
      %69 = vector.broadcast %cst_41 : f32 to vector<1x1xf32>
      %70 = arith.cmpf oeq, %52, %69 : vector<1x1xf32>
      %cst_42 = arith.constant 0.000000e+00 : f32
      %71 = vector.broadcast %cst_42 : f32 to vector<1x1xf32>
      %72 = arith.select %70, %71, %68 : vector<1x1xi1>, vector<1x1xf32>
      %c0_43 = arith.constant 0 : index
      %c0_44 = arith.constant 0 : index
      %73 = vector.load %arg3[%c0_43, %c0_44] : memref<1x1xf32, #tpu.memory_space<vmem>>, vector<1x1xf32>
      tpu.vector_store %arg3[%c0_43, %c0_44], %72 {strides = array<i32>} : memref<1x1xf32, #tpu.memory_space<vmem>>, vector<1x1xf32>,
    } else {
    }
    return
  }
  func.func @transform_0(%arg0: i32) -> (i32, i32, i32) {
    %c0_i32 = arith.constant 0 : i32
    %c0_i32_0 = arith.constant 0 : i32
    %c0_i32_1 = arith.constant 0 : i32
    return %arg0, %c0_i32, %c0_i32_0 : i32, i32, i32
  }
  func.func @transform_1(%arg0: i32) -> (i32, i32, i32) {
    %c0_i32 = arith.constant 0 : i32
    %c0_i32_0 = arith.constant 0 : i32
    %c0_i32_1 = arith.constant 0 : i32
    return %arg0, %c0_i32, %c0_i32_0 : i32, i32, i32
  }
  func.func @transform_2(%arg0: i32) -> (i32, i32) {
    %c0_i32 = arith.constant 0 : i32
    %c0_i32_0 = arith.constant 0 : i32
    %c0_i32_1 = arith.constant 0 : i32
    return %c0_i32, %c0_i32_0 : i32, i32
  }
}

</mosaic_0001>

<bundles_post_ra>
// kernel: tpu_custom_call.1
= control target key start
LH: loop header
LB: loop body
LE: loop exit
PB: predicated region body
PF: predicated region fallthrough
CT: control target
= control target key end

     0   :  { %7 = vsyncpa [#allocation6], 0  ;;  %s287_s0 = inlined_call_operand.hbm [shape: f32[2,8,128], index: 0, kind: input, shape index: {}]   ;;  %s288_s1 = inlined_call_operand.hbm [shape: f32[2,8,128], index: 1, kind: input, shape index: {}]   ;;  %s289_s2 = inlined_call_operand.hbm [shape: f32[1,1], index: 2, kind: output, shape index: {}]  }
   0x1   :  { %8 = vsyncpa [#allocation9], 0 }
   0x2   :  { %9 = vsyncpa [#allocation7], 0  ;;  %s258_s9 = smov [#allocation5]  }
   0x3   :  { %s15_s10 = sshll.u32 %s258_s9, 4  ;;  %s16_s10 = int_to_ptr.vmem [resolvable:$true] %s15_s10 }
   0x4   :  { %s200_s11 = scalar_lea.vmem %s16_s10, 256  ;;  %p205_p1 = scmp.lt.s32.totalorder %s16_s10, %s16_s10 }
   0x5   :  { %p201_p0 = scmp.ne.s32.totalorder %s16_s10, %s200_s11  ;;  %p206_p2 = scmp.lt.s32.totalorder %s200_s11, %s200_s11 }
   0x7   :  { %p207_p3 = por %p206_p2, %p205_p1 }
   0x9   :  { %p208_p4 = pnand %p207_p3, %p201_p0 }
   0xb   :  { %211 = shalt.err (!%p208_p4)
}
   0xc   :  { %s259_s12 = smov 128   ;;  %s260_s13 = smov 8  }
   0xd   :  { %21 = dma.hbm_to_vmem [thread:$0]  %s287_s0, 256, %s16_s10, [#allocation6], %s259_s12, %s259_s12, %s260_s13  }
   0xe   :  { %s261_s16 = smov [#allocation8]  }
   0xf   :  { %s27_s17 = sshll.u32 %s261_s16, 4  ;;  %s28_s17 = int_to_ptr.vmem [resolvable:$true] %s27_s17 }
  0x10   :  { %s220_s18 = scalar_lea.vmem %s28_s17, 256  ;;  %p225_p6 = scmp.lt.s32.totalorder %s28_s17, %s28_s17 }
  0x11   :  { %p221_p5 = scmp.ne.s32.totalorder %s28_s17, %s220_s18  ;;  %p226_p7 = scmp.lt.s32.totalorder %s220_s18, %s220_s18 }
  0x13   :  { %p227_p8 = por %p226_p7, %p225_p6 }
  0x15   :  { %p228_p9 = pnand %p227_p8, %p221_p5 }
  0x17   :  { %231 = shalt.err (!%p228_p9)
}
  0x18   :  { %33 = dma.hbm_to_vmem [thread:$0]  %s288_s1, 256, %s28_s17, [#allocation9], %s259_s12, %s259_s12, %s260_s13  }
  0x19   :  { %252 = dma.done.wait [#allocation6], 256  }
  0x1a   :  { %253 = vsyncadd [#allocation6], 4294967040 }
  0x1b   :  { %254 = dma.done.wait [#allocation9], 256  }
  0x1c   :  { %255 = vsyncadd [#allocation9], 4294967040  ;;  %v49_v0 = vld [vmem:[#allocation8] sm:$0xff]  ;;  %v50_v1 = vld [vmem:[#allocation8 + $0x8] sm:$0xff]  ;;  %s262_s22 = smov [#allocation10]   ;;  %vm152_vm2 = vcmask 0  }
  0x1d   :  { %v47_v2 = vld [vmem:[#allocation5] sm:$0xff]  ;;  %v100_v3 = vadd.f32 %v50_v1, %v49_v0  ;;  %v48_v4 = vld [vmem:[#allocation5 + $0x8] sm:$0xff]  ;;  %v83_v23 = vsub.f32 1.0, %v49_v0  ;;  %v84_v24 = vsub.f32 1.0, %v50_v1  ;;  %s160_s23 = sshll.u32 %s262_s22, 4  ;;  %s161_s23 = int_to_ptr.vmem [resolvable:$true] %s160_s23 }
  0x1e   :  { %v51_v5 = vand.u32 2147483647, %v47_v2  ;;  %v52_v6 = vand.u32 2147483647, %v48_v4  ;;  %v77_v20 = vsub.f32 0.0, %v47_v2  ;;  %v78_v22 = vsub.f32 0.0, %v48_v4  ;;  %p237_p11 = scmp.lt.s32.totalorder %s161_s23, %s161_s23 }
  0x1f   :  { %129 = vadd.xlane.f32.xlu1 %v100_v3  ;;  %v85_v33 = vmul.f32 %v83_v23, %v47_v2  ;;  %v86_v35 = vmul.f32 %v84_v24, %v48_v4  ;;  %s232_s24 = scalar_lea.vmem %s161_s23, 16  ;;  %s236_s25 = scalar_lea.vmem %s161_s23, 32 }
  0x20   :  { %v53_v7 = vsub.f32 0.0, %v51_v5  ;;  %v54_v8 = vsub.f32 0.0, %v52_v6  ;;  %v79_v28 = vmax.f32 %v77_v20, 0.0  ;;  %v80_v31 = vmax.f32 %v78_v22, 0.0  ;;  %p233_p10 = scmp.ne.s32.totalorder %s161_s23, %s232_s24  ;;  %p238_p12 = scmp.lt.s32.totalorder %s236_s25, %s232_s24 }
  0x22   :  { %v55_v9 = vmul.f32 1.442695, %v53_v7  ;;  %v57_v10 = vmul.f32 1.442695, %v54_v8  ;;  %p239_p13 = por %p238_p12, %p237_p11 }
  0x24   :  { %182 = vpow2.f32 %v55_v9  ;;  %p240_p0 = pnand %p239_p13, %p233_p10 }
  0x25   :  { %184 = vpow2.f32 %v57_v10 }
  0x31   :  { %v183_v11 = vpop.eup %182 }
  0x32   :  { %v185_v12 = vpop.eup %184  ;;  %v59_v13 = vadd.f32 1.0, %v183_v11  ;;  %v62_v15 = vmul.f32 -0.5, %v183_v11  ;;  %v65_v18 = vand.u32 2147483647, %v183_v11 }
  0x33   :  { %v68_v14 = vadd.f32 1.0, %v185_v12  ;;  %v71_v16 = vmul.f32 -0.5, %v185_v12  ;;  %v74_v21 = vand.u32 2147483647, %v185_v12 }
  0x34   :  { %186 = vlog2.f32 %v59_v13  ;;  %v63_v17 = vadd.f32 1.0, %v62_v15  ;;  %vm66_vm0 = vcmp.lt.f32.partialorder %v65_v18, 0.0004427343 }
  0x35   :  { %188 = vlog2.f32 %v68_v14  ;;  %v72_v19 = vadd.f32 1.0, %v71_v16  ;;  %vm75_vm1 = vcmp.lt.f32.partialorder %v74_v21, 0.0004427343 }
  0x36   :  { %v64_v25 = vmul.f32 %v183_v11, %v63_v17 }
  0x37   :  { %v73_v27 = vmul.f32 %v185_v12, %v72_v19 }
  0x41   :  { %v187_v26 = vpop.eup %186 }
  0x42   :  { %v189_v29 = vpop.eup %188  ;;  %v61_v30 = vmul.f32 0.6931472, %v187_v26 }
  0x43   :  { %v70_v32 = vmul.f32 0.6931472, %v189_v29 }
  0x44   :  { %v67_v34 = vsel %vm66_vm0, %v64_v25, %v61_v30 }
  0x45   :  { %v76_v36 = vsel %vm75_vm1, %v73_v27, %v70_v32  ;;  %v81_v37 = vadd.f32 %v79_v28, %v67_v34 }
  0x46   :  { %v82_v38 = vadd.f32 %v80_v31, %v76_v36 }
  0x47   :  { %v87_v39 = vadd.f32 %v85_v33, %v81_v37  ;;  %v89_v41 = vmul.f32 %v81_v37, %v49_v0 }
  0x48   :  { %v88_v40 = vadd.f32 %v86_v35, %v82_v38  ;;  %v90_v42 = vmul.f32 %v82_v38, %v50_v1 }
  0x4a   :  { %v92_v43 = vadd.f32 %v88_v40, %v87_v39  ;;  %v96_v44 = vadd.f32 %v90_v42, %v89_v41 }
  0x4c   :  { %107 = vadd.xlane.f32.xlu0 %v92_v43 }
  0x50   :  { %118 = vadd.xlane.f32.xlu0 %v96_v44 }
  0xa8   :  { %v130_v45 = vpop.xlane.xlu1 %129 }
  0xa9   :  { %v131_v46 = vrot.slane %v130_v45, 4 }
  0xab   :  { %v132_v47 = vadd.f32 %v131_v46, %v130_v45 }
  0xad   :  { %v133_v51 = vrot.slane %v132_v47, 2 }
  0xaf   :  { %v134_v57 = vadd.f32 %v133_v51, %v132_v47 }
  0xb1   :  { %v135_v62 = vrot.slane %v134_v57, 1 }
  0xb3   :  { %v136_v1 = vadd.f32 %v135_v62, %v134_v57 }
  0xd5   :  { %v108_v48 = vpop.xlane.xlu0 %107 }
  0xd6   :  { %v109_v49 = vrot.slane %v108_v48, 4 }
  0xd8   :  { %v110_v50 = vadd.f32 %v109_v49, %v108_v48 }
  0xd9   :  { %v119_v52 = vpop.xlane.xlu0 %118 }
  0xda   :  { %v111_v53 = vrot.slane %v110_v50, 2  ;;  %v120_v54 = vrot.slane %v119_v52, 4 }
  0xdc   :  { %v121_v55 = vadd.f32 %v120_v54, %v119_v52  ;;  %v112_v56 = vadd.f32 %v111_v53, %v110_v50 }
  0xde   :  { %v122_v58 = vrot.slane %v121_v55, 2  ;;  %v113_v59 = vrot.slane %v112_v56, 1 }
  0xe0   :  { %v123_v60 = vadd.f32 %v122_v58, %v121_v55  ;;  %v114_v61 = vadd.f32 %v113_v59, %v112_v56 }
  0xe2   :  { %171 = vpush %v114_v61  ;;  %v124_v63 = vrot.slane %v123_v60, 1 }
  0xe4   :  { %v125_v0 = vadd.f32 %v124_v63, %v123_v60 }
  0xe6   :  { %173 = vpush %v125_v0 }
  0xe7   :  { %175 = vpush %v136_v1 }
 0x113   :  { %s172_s0 = spop %171 }
 0x114   :  { %v116_v11 = vstv %s172_s0 }
 0x117   :  { %s174_s1 = spop %173 }
 0x118   :  { %s176_s21 = spop %175  ;;  %v127_v9 = vstv %s174_s1 }
 0x119   :  { %v138_v2 = vstv %s176_s21 }
 0x11a   :  { %v139_v3 = vsub.f32 2048.0, %v138_v2  ;;  %vm150_vm3 = vcmp.eq.f32.partialorder %v138_v2, 0.0 }
 0x11c   :  { %v141_v4 = vmul.f32 0.00048828125, %v139_v3 }
 0x11e   :  { %v142_v5 = vsub.f32 1.0, %v141_v4 }
 0x120   :  { %190 = vrcp.f32 %v142_v5 }
 0x12d   :  { %v191_v6 = vpop.eup %190 }
 0x12e   :  { %v144_v7 = vmul.f32 %v191_v6, %v141_v4 }
 0x130   :  { %v170_v8 = vadd.f32 -1.0, %v144_v7 }
 0x132   :  { %v146_v10 = vmul.f32 %v170_v8, %v127_v9 }
 0x134   :  { %v147_v12 = vadd.f32 %v146_v10, %v116_v11 }
 0x136   :  { %v148_v13 = vmul.f32 %v147_v12, %v142_v5 }
 0x138   :  { %v149_v14 = vmul.f32 0.00048828125, %v148_v13 }
 0x13a   :  { %v151_v15 = vsel %vm150_vm3, 0.0, %v149_v14 }
 0x13b   :  { %153 = vst.msk [vmem:[#allocation10] sm:$0x1] %vm152_vm2, %v151_v15 }
 0x13c   :  { %243 = shalt.err (!%p240_p0)
}
 0x13d   :  { %163 = dma.vmem_to_hbm [thread:$0]  %s161_s23, 16, %s289_s2, [#allocation7]  }
 0x13e   :  { %256 = dma.done.wait [#allocation7], 16  }
 0x13f   :  { %257 = vsyncadd [#allocation7], 4294967280 }
 0x140   :  { %167 = vsyncpa [#allocation6], 1 }
 0x141   :  { %168 = vsyncpa [#allocation9], 1 }
 0x142   :  { %169 = vsyncpa [#allocation7], 1 }

</bundles_post_ra>
